<compile_context>
chip_gen: v6e
topology: v6e:2x2x1
jax: 0.10.0
libtpu: 0.0.40
codegen_flags: <defaults>
</compile_context>

<pallas_src>
import jax
import jax.numpy as jnp
from jax import lax
from jax.experimental import pallas as pl
from jax.experimental.pallas import tpu as pltpu


def bert_embedding_kernel(seq_ref,        # SMEM scalar-prefetch: (B*S,) int32 token ids
                          pos_ref,        # VMEM (row_tile, E) f32 positional-encoding tile
                          seg_id_ref,     # VMEM (1, row_tile, 1) int32 segment ids
                          seg_tab_ref,    # VMEM (NSEG, E) segment table (resident, tiny)
                          tok_hbm,        # HBM (ANY) token table (V, E), native dtype
                          out_ref,        # VMEM (1, row_tile, E)
                          tok_buf,        # VMEM (2, row_tile, E) double-buffered token rows
                          tok_sem):       # DMA sems (2,) — one per slot
    _, row_tile, E = tok_buf.shape
    V = tok_hbm.shape[0]
    NSEG = seg_tab_ref.shape[0]

    b = pl.program_id(0)
    t = pl.program_id(1)
    n_tiles = pl.num_programs(1)
    S = n_tiles * row_tile

    def issue_tile(tile_idx, slot):
        base = b * S + tile_idx * row_tile

        def issue_row(r, carry):
            tid = seq_ref[base + r]
            # clamp so a bad id reads a valid row instead of arbitrary HBM
            tid = jnp.minimum(jnp.maximum(tid, 0), V - 1)
            pltpu.make_async_copy(
                tok_hbm.at[pl.ds(tid, 1), :],
                tok_buf.at[slot, pl.ds(r, 1), :],
                tok_sem.at[slot],
            ).start()
            return carry

        # modest unroll: descriptor pushes (vector-misc slot) and clamps (scalar slots)
        # co-issue across iterations
        lax.fori_loop(0, row_tile, issue_row, 0,
                      unroll=True if row_tile <= 32 else 8)

    slot = lax.rem(t, 2)

    # Prime: first tile of each batch row issues its own gathers (correct even when the
    # batch axis is megacore-split, since it fires per-b, not only at the global step 0).
    @pl.when(t == 0)
    def _():
        issue_tile(0, 0)

    # Lookahead: prefetch the NEXT tile's token rows into the other slot before waiting.
    @pl.when(t + 1 < n_tiles)
    def _():
        issue_tile(t + 1, lax.rem(t + 1, 2))

    # One aggregate wait for the current tile: descriptor bytes (whole slot buffer)
    # equal the sum of the per-row copies issued against this slot's semaphore.
    pltpu.make_async_copy(tok_buf.at[slot], tok_buf.at[slot], tok_sem.at[slot]).wait()

    tok = tok_buf[slot].astype(jnp.float32)          # (row_tile, E)
    pos = pos_ref[...].astype(jnp.float32)           # (row_tile, E)

    # Segment embedding via NSEG static selects from the VMEM-resident table (no DMA).
    seg_id = seg_id_ref[0]                            # (row_tile, 1) int32
    seg = jnp.zeros((row_tile, E), jnp.float32)
    for n in range(NSEG):                             # NSEG is a compile-time constant
        row_n = seg_tab_ref[n, :].astype(jnp.float32)[None, :]   # (1, E)
        seg = jnp.where(seg_id == n, row_n, seg)

    # PyTorch module semantics: tok + seg + (tok + pos) = 2*tok + seg + pos.
    # Dropout = identity (eval mode).
    out_ref[0] = ((tok + tok) + seg + pos).astype(out_ref.dtype)


def bert_embedding(seq, seg, tok_table, seg_table, pos_enc, *,
                   row_tile=None, out_dtype=jnp.float32):
    B, S = seq.shape
    V, E = tok_table.shape
    NSEG, E2 = seg_table.shape
    assert E2 == E and pos_enc.shape == (S, E)

    if row_tile is None:
        # Large lane-dense tiles amortize per-step overhead; cap at 512 so
        # pos + out + 2x token-gather scratch stay well inside v7x's default
        # scoped VMEM limit even at E=1024.
        row_tile = min(S, 512)
    assert S % row_tile == 0 and row_tile % 8 == 0
    n_tiles = S // row_tile

    seq_flat = seq.astype(jnp.int32).reshape(B * S)
    seg_col = jnp.clip(seg.astype(jnp.int32), 0, NSEG - 1).reshape(B, S, 1)

    grid_spec = pltpu.PrefetchScalarGridSpec(
        num_scalar_prefetch=1,
        grid=(B, n_tiles),
        in_specs=[
            pl.BlockSpec((row_tile, E), lambda b, t, seq_r: (t, 0)),        # pos tile
            pl.BlockSpec((1, row_tile, 1), lambda b, t, seq_r: (b, t, 0)),  # seg id column
            pl.BlockSpec((NSEG, E), lambda b, t, seq_r: (0, 0)),            # seg table -> VMEM
            pl.BlockSpec(memory_space=pl.ANY),                              # tok table stays in HBM
        ],
        out_specs=pl.BlockSpec((1, row_tile, E), lambda b, t, seq_r: (b, t, 0)),
        scratch_shapes=[
            pltpu.VMEM((2, row_tile, E), tok_table.dtype),  # native-dtype gather scratch
            pltpu.SemaphoreType.DMA((2,)),                  # one sem per slot
        ],
    )

    return pl.pallas_call(
        bert_embedding_kernel,
        out_shape=jax.ShapeDtypeStruct((B, S, E), out_dtype),
        grid_spec=grid_spec,
        compiler_params=pltpu.CompilerParams(
            dimension_semantics=("parallel", "arbitrary")),
    )(seq_flat, pos_enc.astype(jnp.float32), seg_col, seg_table, tok_table)


def make_positional_encoding(max_len, embed_dim):
    position = jnp.arange(0, max_len, dtype=jnp.float32)[:, None]
    div_term = jnp.exp(
        jnp.arange(0, embed_dim, 2, dtype=jnp.float32)
        * (-(jnp.log(jnp.float32(10000.0)) / embed_dim))
    )
    enc = jnp.zeros((max_len, embed_dim), dtype=jnp.float32)
    enc = enc.at[:, 0::2].set(jnp.sin(position * div_term))
    enc = enc.at[:, 1::2].set(jnp.cos(position * div_term))
    return enc


if __name__ == "__main__":
    # Small shapes consistent with the module. PyTorch's `x + encoding` broadcast
    # requires seq_len == max_len; E=128 keeps every output store lane-dense.
    B, S, E = 2, 8, 128
    vocab_size, n_segments, max_len = 64, 3, S

    key = jax.random.PRNGKey(0)
    k1, k2, k3, k4 = jax.random.split(key, 4)

    tok_table = jax.random.normal(k1, (vocab_size, E), dtype=jnp.float32)
    seg_table = jax.random.normal(k2, (n_segments, E), dtype=jnp.float32)
    pos_enc = make_positional_encoding(max_len, E)

    seq = jax.random.randint(k3, (B, S), 0, vocab_size, dtype=jnp.int32)
    seg = jax.random.randint(k4, (B, S), 0, n_segments, dtype=jnp.int32)

    out = bert_embedding(seq, seg, tok_table, seg_table, pos_enc, row_tile=S)
    out = jax.block_until_ready(out)

    # Pure-JAX reference of the exact PyTorch forward semantics
    # (the module adds the token embeddings twice: tok + seg + (tok + pos)).
    ref_tok = tok_table[seq]                    # (B, S, E)
    ref_seg = seg_table[seg]                    # (B, S, E)
    ref = ref_tok + ref_seg + (ref_tok + pos_enc[None, :, :])
    assert out.shape == (B, S, E)
    assert jnp.allclose(out, ref, atol=1e-5, rtol=1e-5)

    print("KERNEL_OK")
</pallas_src>

<mosaic_0001>
module attributes {stable_mosaic.version = 11 : i64} {
  func.func @bert_embedding_kernel(%arg0: i32, %arg1: i32, %arg2: memref<16xi32, #tpu.memory_space<smem>>, %arg3: memref<8x128xf32, #tpu.memory_space<vmem>>, %arg4: memref<1x8x1xi32, #tpu.memory_space<vmem>>, %arg5: memref<3x128xf32, #tpu.memory_space<vmem>>, %arg6: memref<64x128xf32, #tpu.memory_space<any>>, %arg7: memref<1x8x128xf32, #tpu.memory_space<vmem>>, %arg8: memref<2x8x128xf32, #tpu.memory_space<vmem>>, %arg9: memref<2x!tpu.dma_semaphore, #tpu.memory_space<semaphore_mem>>) attributes {dimension_semantics = [#tpu.dimension_semantics<parallel>, #tpu.dimension_semantics<arbitrary>], iteration_bounds = array<i64: 2, 1>, scalar_prefetch = 1 : i64, scratch_operands = 2 : i64, tpu.core_type = #tpu.core_type<tc>, window_params = [{transform_indices = @transform_0, window_bounds = array<i64: 8, 128>}, {transform_indices = @transform_1, window_bounds = array<i64: 1, 8, 1>}, {pipeline_mode = #tpu.pipeline_mode<synchronous>, transform_indices = @transform_2, window_bounds = array<i64: 3, 128>}, {}, {transform_indices = @transform_4, window_bounds = array<i64: 1, 8, 128>}]} {
    %c2_i32 = arith.constant 2 : i32
    %0 = arith.remsi %arg1, %c2_i32 : i32
    %c0_i32 = arith.constant 0 : i32
    %1 = arith.cmpi eq, %arg1, %c0_i32 : i32
    %2 = arith.extui %1 : i1 to i32
    %c0_i32_0 = arith.constant 0 : i32
    %3 = arith.cmpi ne, %2, %c0_i32_0 : i32
    scf.if %3 {
      %c8_i32 = arith.constant 8 : i32
      %57 = arith.muli %arg0, %c8_i32 : i32
      %c0_i32_23 = arith.constant 0 : i32
      %58 = arith.addi %57, %c0_i32_23 : i32
      %c0_i32_24 = arith.constant 0 : i32
      %59 = arith.addi %58, %c0_i32_24 : i32
      %60 = arith.index_cast %59 : i32 to index
      %61 = memref.load %arg2[%60] : memref<16xi32, #tpu.memory_space<smem>>
      %c0_i32_25 = arith.constant 0 : i32
      %62 = arith.maxsi %61, %c0_i32_25 : i32
      %c63_i32 = arith.constant 63 : i32
      %63 = arith.minsi %62, %c63_i32 : i32
      %c0_i32_26 = arith.constant 0 : i32
      %c0_i32_27 = arith.constant 0 : i32
      %c0_i32_28 = arith.constant 0 : i32
      %64 = tpu.memref_slice %arg6[%63, %c0_i32_28] : memref<64x128xf32, #tpu.memory_space<any>> -> memref<1x128xf32, #tpu.memory_space<any>>
      %c0_i32_29 = arith.constant 0 : i32
      %65 = tpu.memref_slice %arg8[%c0_i32_26, %c0_i32_24, %c0_i32_29] : memref<2x8x128xf32, #tpu.memory_space<vmem>> -> memref<1x1x128xf32, #tpu.memory_space<vmem>>
      %66 = tpu.memref_squeeze %65 : memref<1x1x128xf32, #tpu.memory_space<vmem>> -> memref<1x128xf32, #tpu.memory_space<vmem>>
      %67 = tpu.memref_slice %arg9[%c0_i32_27] : memref<2x!tpu.dma_semaphore, #tpu.memory_space<semaphore_mem>> -> memref<1x!tpu.dma_semaphore, #tpu.memory_space<semaphore_mem>>
      %68 = tpu.memref_squeeze %67 : memref<1x!tpu.dma_semaphore, #tpu.memory_space<semaphore_mem>> -> memref<!tpu.dma_semaphore, #tpu.memory_space<semaphore_mem>>
      tpu.enqueue_dma source(%64 : memref<1x128xf32, #tpu.memory_space<any>>) target(%66 : memref<1x128xf32, #tpu.memory_space<vmem>>) target_semaphore(%68 : memref<!tpu.dma_semaphore, #tpu.memory_space<semaphore_mem>>)
      %c1_i32_30 = arith.constant 1 : i32
      %69 = arith.addi %58, %c1_i32_30 : i32
      %70 = arith.index_cast %69 : i32 to index
      %71 = memref.load %arg2[%70] : memref<16xi32, #tpu.memory_space<smem>>
      %c0_i32_31 = arith.constant 0 : i32
      %72 = arith.maxsi %71, %c0_i32_31 : i32
      %c63_i32_32 = arith.constant 63 : i32
      %73 = arith.minsi %72, %c63_i32_32 : i32
      %c0_i32_33 = arith.constant 0 : i32
      %c0_i32_34 = arith.constant 0 : i32
      %c0_i32_35 = arith.constant 0 : i32
      %74 = tpu.memref_slice %arg6[%73, %c0_i32_35] : memref<64x128xf32, #tpu.memory_space<any>> -> memref<1x128xf32, #tpu.memory_space<any>>
      %c0_i32_36 = arith.constant 0 : i32
      %75 = tpu.memref_slice %arg8[%c0_i32_33, %c1_i32_30, %c0_i32_36] : memref<2x8x128xf32, #tpu.memory_space<vmem>> -> memref<1x1x128xf32, #tpu.memory_space<vmem>>
      %76 = tpu.memref_squeeze %75 : memref<1x1x128xf32, #tpu.memory_space<vmem>> -> memref<1x128xf32, #tpu.memory_space<vmem>>
      %77 = tpu.memref_slice %arg9[%c0_i32_34] : memref<2x!tpu.dma_semaphore, #tpu.memory_space<semaphore_mem>> -> memref<1x!tpu.dma_semaphore, #tpu.memory_space<semaphore_mem>>
      %78 = tpu.memref_squeeze %77 : memref<1x!tpu.dma_semaphore, #tpu.memory_space<semaphore_mem>> -> memref<!tpu.dma_semaphore, #tpu.memory_space<semaphore_mem>>
      tpu.enqueue_dma source(%74 : memref<1x128xf32, #tpu.memory_space<any>>) target(%76 : memref<1x128xf32, #tpu.memory_space<vmem>>) target_semaphore(%78 : memref<!tpu.dma_semaphore, #tpu.memory_space<semaphore_mem>>)
      %c2_i32_37 = arith.constant 2 : i32
      %79 = arith.addi %58, %c2_i32_37 : i32
      %80 = arith.index_cast %79 : i32 to index
      %81 = memref.load %arg2[%80] : memref<16xi32, #tpu.memory_space<smem>>
      %c0_i32_38 = arith.constant 0 : i32
      %82 = arith.maxsi %81, %c0_i32_38 : i32
      %c63_i32_39 = arith.constant 63 : i32
      %83 = arith.minsi %82, %c63_i32_39 : i32
      %c0_i32_40 = arith.constant 0 : i32
      %c0_i32_41 = arith.constant 0 : i32
      %c0_i32_42 = arith.constant 0 : i32
      %84 = tpu.memref_slice %arg6[%83, %c0_i32_42] : memref<64x128xf32, #tpu.memory_space<any>> -> memref<1x128xf32, #tpu.memory_space<any>>
      %c0_i32_43 = arith.constant 0 : i32
      %85 = tpu.memref_slice %arg8[%c0_i32_40, %c2_i32_37, %c0_i32_43] : memref<2x8x128xf32, #tpu.memory_space<vmem>> -> memref<1x1x128xf32, #tpu.memory_space<vmem>>
      %86 = tpu.memref_squeeze %85 : memref<1x1x128xf32, #tpu.memory_space<vmem>> -> memref<1x128xf32, #tpu.memory_space<vmem>>
      %87 = tpu.memref_slice %arg9[%c0_i32_41] : memref<2x!tpu.dma_semaphore, #tpu.memory_space<semaphore_mem>> -> memref<1x!tpu.dma_semaphore, #tpu.memory_space<semaphore_mem>>
      %88 = tpu.memref_squeeze %87 : memref<1x!tpu.dma_semaphore, #tpu.memory_space<semaphore_mem>> -> memref<!tpu.dma_semaphore, #tpu.memory_space<semaphore_mem>>
      tpu.enqueue_dma source(%84 : memref<1x128xf32, #tpu.memory_space<any>>) target(%86 : memref<1x128xf32, #tpu.memory_space<vmem>>) target_semaphore(%88 : memref<!tpu.dma_semaphore, #tpu.memory_space<semaphore_mem>>)
      %c3_i32 = arith.constant 3 : i32
      %89 = arith.addi %58, %c3_i32 : i32
      %90 = arith.index_cast %89 : i32 to index
      %91 = memref.load %arg2[%90] : memref<16xi32, #tpu.memory_space<smem>>
      %c0_i32_44 = arith.constant 0 : i32
      %92 = arith.maxsi %91, %c0_i32_44 : i32
      %c63_i32_45 = arith.constant 63 : i32
      %93 = arith.minsi %92, %c63_i32_45 : i32
      %c0_i32_46 = arith.constant 0 : i32
      %c0_i32_47 = arith.constant 0 : i32
      %c0_i32_48 = arith.constant 0 : i32
      %94 = tpu.memref_slice %arg6[%93, %c0_i32_48] : memref<64x128xf32, #tpu.memory_space<any>> -> memref<1x128xf32, #tpu.memory_space<any>>
      %c0_i32_49 = arith.constant 0 : i32
      %95 = tpu.memref_slice %arg8[%c0_i32_46, %c3_i32, %c0_i32_49] : memref<2x8x128xf32, #tpu.memory_space<vmem>> -> memref<1x1x128xf32, #tpu.memory_space<vmem>>
      %96 = tpu.memref_squeeze %95 : memref<1x1x128xf32, #tpu.memory_space<vmem>> -> memref<1x128xf32, #tpu.memory_space<vmem>>
      %97 = tpu.memref_slice %arg9[%c0_i32_47] : memref<2x!tpu.dma_semaphore, #tpu.memory_space<semaphore_mem>> -> memref<1x!tpu.dma_semaphore, #tpu.memory_space<semaphore_mem>>
      %98 = tpu.memref_squeeze %97 : memref<1x!tpu.dma_semaphore, #tpu.memory_space<semaphore_mem>> -> memref<!tpu.dma_semaphore, #tpu.memory_space<semaphore_mem>>
      tpu.enqueue_dma source(%94 : memref<1x128xf32, #tpu.memory_space<any>>) target(%96 : memref<1x128xf32, #tpu.memory_space<vmem>>) target_semaphore(%98 : memref<!tpu.dma_semaphore, #tpu.memory_space<semaphore_mem>>)
      %c4_i32 = arith.constant 4 : i32
      %99 = arith.addi %58, %c4_i32 : i32
      %100 = arith.index_cast %99 : i32 to index
      %101 = memref.load %arg2[%100] : memref<16xi32, #tpu.memory_space<smem>>
      %c0_i32_50 = arith.constant 0 : i32
      %102 = arith.maxsi %101, %c0_i32_50 : i32
      %c63_i32_51 = arith.constant 63 : i32
      %103 = arith.minsi %102, %c63_i32_51 : i32
      %c0_i32_52 = arith.constant 0 : i32
      %c0_i32_53 = arith.constant 0 : i32
      %c0_i32_54 = arith.constant 0 : i32
      %104 = tpu.memref_slice %arg6[%103, %c0_i32_54] : memref<64x128xf32, #tpu.memory_space<any>> -> memref<1x128xf32, #tpu.memory_space<any>>
      %c0_i32_55 = arith.constant 0 : i32
      %105 = tpu.memref_slice %arg8[%c0_i32_52, %c4_i32, %c0_i32_55] : memref<2x8x128xf32, #tpu.memory_space<vmem>> -> memref<1x1x128xf32, #tpu.memory_space<vmem>>
      %106 = tpu.memref_squeeze %105 : memref<1x1x128xf32, #tpu.memory_space<vmem>> -> memref<1x128xf32, #tpu.memory_space<vmem>>
      %107 = tpu.memref_slice %arg9[%c0_i32_53] : memref<2x!tpu.dma_semaphore, #tpu.memory_space<semaphore_mem>> -> memref<1x!tpu.dma_semaphore, #tpu.memory_space<semaphore_mem>>
      %108 = tpu.memref_squeeze %107 : memref<1x!tpu.dma_semaphore, #tpu.memory_space<semaphore_mem>> -> memref<!tpu.dma_semaphore, #tpu.memory_space<semaphore_mem>>
      tpu.enqueue_dma source(%104 : memref<1x128xf32, #tpu.memory_space<any>>) target(%106 : memref<1x128xf32, #tpu.memory_space<vmem>>) target_semaphore(%108 : memref<!tpu.dma_semaphore, #tpu.memory_space<semaphore_mem>>)
      %c5_i32 = arith.constant 5 : i32
      %109 = arith.addi %58, %c5_i32 : i32
      %110 = arith.index_cast %109 : i32 to index
      %111 = memref.load %arg2[%110] : memref<16xi32, #tpu.memory_space<smem>>
      %c0_i32_56 = arith.constant 0 : i32
      %112 = arith.maxsi %111, %c0_i32_56 : i32
      %c63_i32_57 = arith.constant 63 : i32
      %113 = arith.minsi %112, %c63_i32_57 : i32
      %c0_i32_58 = arith.constant 0 : i32
      %c0_i32_59 = arith.constant 0 : i32
      %c0_i32_60 = arith.constant 0 : i32
      %114 = tpu.memref_slice %arg6[%113, %c0_i32_60] : memref<64x128xf32, #tpu.memory_space<any>> -> memref<1x128xf32, #tpu.memory_space<any>>
      %c0_i32_61 = arith.constant 0 : i32
      %115 = tpu.memref_slice %arg8[%c0_i32_58, %c5_i32, %c0_i32_61] : memref<2x8x128xf32, #tpu.memory_space<vmem>> -> memref<1x1x128xf32, #tpu.memory_space<vmem>>
      %116 = tpu.memref_squeeze %115 : memref<1x1x128xf32, #tpu.memory_space<vmem>> -> memref<1x128xf32, #tpu.memory_space<vmem>>
      %117 = tpu.memref_slice %arg9[%c0_i32_59] : memref<2x!tpu.dma_semaphore, #tpu.memory_space<semaphore_mem>> -> memref<1x!tpu.dma_semaphore, #tpu.memory_space<semaphore_mem>>
      %118 = tpu.memref_squeeze %117 : memref<1x!tpu.dma_semaphore, #tpu.memory_space<semaphore_mem>> -> memref<!tpu.dma_semaphore, #tpu.memory_space<semaphore_mem>>
      tpu.enqueue_dma source(%114 : memref<1x128xf32, #tpu.memory_space<any>>) target(%116 : memref<1x128xf32, #tpu.memory_space<vmem>>) target_semaphore(%118 : memref<!tpu.dma_semaphore, #tpu.memory_space<semaphore_mem>>)
      %c6_i32 = arith.constant 6 : i32
      %119 = arith.addi %58, %c6_i32 : i32
      %120 = arith.index_cast %119 : i32 to index
      %121 = memref.load %arg2[%120] : memref<16xi32, #tpu.memory_space<smem>>
      %c0_i32_62 = arith.constant 0 : i32
      %122 = arith.maxsi %121, %c0_i32_62 : i32
      %c63_i32_63 = arith.constant 63 : i32
      %123 = arith.minsi %122, %c63_i32_63 : i32
      %c0_i32_64 = arith.constant 0 : i32
      %c0_i32_65 = arith.constant 0 : i32
      %c0_i32_66 = arith.constant 0 : i32
      %124 = tpu.memref_slice %arg6[%123, %c0_i32_66] : memref<64x128xf32, #tpu.memory_space<any>> -> memref<1x128xf32, #tpu.memory_space<any>>
      %c0_i32_67 = arith.constant 0 : i32
      %125 = tpu.memref_slice %arg8[%c0_i32_64, %c6_i32, %c0_i32_67] : memref<2x8x128xf32, #tpu.memory_space<vmem>> -> memref<1x1x128xf32, #tpu.memory_space<vmem>>
      %126 = tpu.memref_squeeze %125 : memref<1x1x128xf32, #tpu.memory_space<vmem>> -> memref<1x128xf32, #tpu.memory_space<vmem>>
      %127 = tpu.memref_slice %arg9[%c0_i32_65] : memref<2x!tpu.dma_semaphore, #tpu.memory_space<semaphore_mem>> -> memref<1x!tpu.dma_semaphore, #tpu.memory_space<semaphore_mem>>
      %128 = tpu.memref_squeeze %127 : memref<1x!tpu.dma_semaphore, #tpu.memory_space<semaphore_mem>> -> memref<!tpu.dma_semaphore, #tpu.memory_space<semaphore_mem>>
      tpu.enqueue_dma source(%124 : memref<1x128xf32, #tpu.memory_space<any>>) target(%126 : memref<1x128xf32, #tpu.memory_space<vmem>>) target_semaphore(%128 : memref<!tpu.dma_semaphore, #tpu.memory_space<semaphore_mem>>)
      %c7_i32 = arith.constant 7 : i32
      %129 = arith.addi %58, %c7_i32 : i32
      %130 = arith.index_cast %129 : i32 to index
      %131 = memref.load %arg2[%130] : memref<16xi32, #tpu.memory_space<smem>>
      %c0_i32_68 = arith.constant 0 : i32
      %132 = arith.maxsi %131, %c0_i32_68 : i32
      %c63_i32_69 = arith.constant 63 : i32
      %133 = arith.minsi %132, %c63_i32_69 : i32
      %c0_i32_70 = arith.constant 0 : i32
      %c0_i32_71 = arith.constant 0 : i32
      %c0_i32_72 = arith.constant 0 : i32
      %134 = tpu.memref_slice %arg6[%133, %c0_i32_72] : memref<64x128xf32, #tpu.memory_space<any>> -> memref<1x128xf32, #tpu.memory_space<any>>
      %c0_i32_73 = arith.constant 0 : i32
      %135 = tpu.memref_slice %arg8[%c0_i32_70, %c7_i32, %c0_i32_73] : memref<2x8x128xf32, #tpu.memory_space<vmem>> -> memref<1x1x128xf32, #tpu.memory_space<vmem>>
      %136 = tpu.memref_squeeze %135 : memref<1x1x128xf32, #tpu.memory_space<vmem>> -> memref<1x128xf32, #tpu.memory_space<vmem>>
      %137 = tpu.memref_slice %arg9[%c0_i32_71] : memref<2x!tpu.dma_semaphore, #tpu.memory_space<semaphore_mem>> -> memref<1x!tpu.dma_semaphore, #tpu.memory_space<semaphore_mem>>
      %138 = tpu.memref_squeeze %137 : memref<1x!tpu.dma_semaphore, #tpu.memory_space<semaphore_mem>> -> memref<!tpu.dma_semaphore, #tpu.memory_space<semaphore_mem>>
      tpu.enqueue_dma source(%134 : memref<1x128xf32, #tpu.memory_space<any>>) target(%136 : memref<1x128xf32, #tpu.memory_space<vmem>>) target_semaphore(%138 : memref<!tpu.dma_semaphore, #tpu.memory_space<semaphore_mem>>)
      %c8_i32_74 = arith.constant 8 : i32
    } else {
    }
    %c1_i32 = arith.constant 1 : i32
    %4 = arith.addi %arg1, %c1_i32 : i32
    %c1_i32_1 = arith.constant 1 : i32
    %5 = arith.cmpi slt, %4, %c1_i32_1 : i32
    %6 = arith.extui %5 : i1 to i32
    %c0_i32_2 = arith.constant 0 : i32
    %7 = arith.cmpi ne, %6, %c0_i32_2 : i32
    scf.if %7 {
      %c1_i32_23 = arith.constant 1 : i32
      %57 = arith.addi %arg1, %c1_i32_23 : i32
      %c1_i32_24 = arith.constant 1 : i32
      %58 = arith.addi %arg1, %c1_i32_24 : i32
      %c2_i32_25 = arith.constant 2 : i32
      %59 = arith.remsi %58, %c2_i32_25 : i32
      %c8_i32 = arith.constant 8 : i32
      %60 = arith.muli %arg0, %c8_i32 : i32
      %c8_i32_26 = arith.constant 8 : i32
      %61 = arith.muli %57, %c8_i32_26 : i32
      %62 = arith.addi %60, %61 : i32
      %c0_i32_27 = arith.constant 0 : i32
      %63 = arith.addi %62, %c0_i32_27 : i32
      %64 = arith.index_cast %63 : i32 to index
      %65 = memref.load %arg2[%64] : memref<16xi32, #tpu.memory_space<smem>>
      %c0_i32_28 = arith.constant 0 : i32
      %66 = arith.maxsi %65, %c0_i32_28 : i32
      %c63_i32 = arith.constant 63 : i32
      %67 = arith.minsi %66, %c63_i32 : i32
      %c0_i32_29 = arith.constant 0 : i32
      %68 = tpu.memref_slice %arg6[%67, %c0_i32_29] : memref<64x128xf32, #tpu.memory_space<any>> -> memref<1x128xf32, #tpu.memory_space<any>>
      %c0_i32_30 = arith.constant 0 : i32
      %69 = tpu.memref_slice %arg8[%59, %c0_i32_27, %c0_i32_30] : memref<2x8x128xf32, #tpu.memory_space<vmem>> -> memref<1x1x128xf32, #tpu.memory_space<vmem>>
      %70 = tpu.memref_squeeze %69 : memref<1x1x128xf32, #tpu.memory_space<vmem>> -> memref<1x128xf32, #tpu.memory_space<vmem>>
      %71 = tpu.memref_slice %arg9[%59] : memref<2x!tpu.dma_semaphore, #tpu.memory_space<semaphore_mem>> -> memref<1x!tpu.dma_semaphore, #tpu.memory_space<semaphore_mem>>
      %72 = tpu.memref_squeeze %71 : memref<1x!tpu.dma_semaphore, #tpu.memory_space<semaphore_mem>> -> memref<!tpu.dma_semaphore, #tpu.memory_space<semaphore_mem>>
      tpu.enqueue_dma source(%68 : memref<1x128xf32, #tpu.memory_space<any>>) target(%70 : memref<1x128xf32, #tpu.memory_space<vmem>>) target_semaphore(%72 : memref<!tpu.dma_semaphore, #tpu.memory_space<semaphore_mem>>)
      %c1_i32_31 = arith.constant 1 : i32
      %73 = arith.addi %62, %c1_i32_31 : i32
      %74 = arith.index_cast %73 : i32 to index
      %75 = memref.load %arg2[%74] : memref<16xi32, #tpu.memory_space<smem>>
      %c0_i32_32 = arith.constant 0 : i32
      %76 = arith.maxsi %75, %c0_i32_32 : i32
      %c63_i32_33 = arith.constant 63 : i32
      %77 = arith.minsi %76, %c63_i32_33 : i32
      %c0_i32_34 = arith.constant 0 : i32
      %78 = tpu.memref_slice %arg6[%77, %c0_i32_34] : memref<64x128xf32, #tpu.memory_space<any>> -> memref<1x128xf32, #tpu.memory_space<any>>
      %c0_i32_35 = arith.constant 0 : i32
      %79 = tpu.memref_slice %arg8[%59, %c1_i32_31, %c0_i32_35] : memref<2x8x128xf32, #tpu.memory_space<vmem>> -> memref<1x1x128xf32, #tpu.memory_space<vmem>>
      %80 = tpu.memref_squeeze %79 : memref<1x1x128xf32, #tpu.memory_space<vmem>> -> memref<1x128xf32, #tpu.memory_space<vmem>>
      %81 = tpu.memref_slice %arg9[%59] : memref<2x!tpu.dma_semaphore, #tpu.memory_space<semaphore_mem>> -> memref<1x!tpu.dma_semaphore, #tpu.memory_space<semaphore_mem>>
      %82 = tpu.memref_squeeze %81 : memref<1x!tpu.dma_semaphore, #tpu.memory_space<semaphore_mem>> -> memref<!tpu.dma_semaphore, #tpu.memory_space<semaphore_mem>>
      tpu.enqueue_dma source(%78 : memref<1x128xf32, #tpu.memory_space<any>>) target(%80 : memref<1x128xf32, #tpu.memory_space<vmem>>) target_semaphore(%82 : memref<!tpu.dma_semaphore, #tpu.memory_space<semaphore_mem>>)
      %c2_i32_36 = arith.constant 2 : i32
      %83 = arith.addi %62, %c2_i32_36 : i32
      %84 = arith.index_cast %83 : i32 to index
      %85 = memref.load %arg2[%84] : memref<16xi32, #tpu.memory_space<smem>>
      %c0_i32_37 = arith.constant 0 : i32
      %86 = arith.maxsi %85, %c0_i32_37 : i32
      %c63_i32_38 = arith.constant 63 : i32
      %87 = arith.minsi %86, %c63_i32_38 : i32
      %c0_i32_39 = arith.constant 0 : i32
      %88 = tpu.memref_slice %arg6[%87, %c0_i32_39] : memref<64x128xf32, #tpu.memory_space<any>> -> memref<1x128xf32, #tpu.memory_space<any>>
      %c0_i32_40 = arith.constant 0 : i32
      %89 = tpu.memref_slice %arg8[%59, %c2_i32_36, %c0_i32_40] : memref<2x8x128xf32, #tpu.memory_space<vmem>> -> memref<1x1x128xf32, #tpu.memory_space<vmem>>
      %90 = tpu.memref_squeeze %89 : memref<1x1x128xf32, #tpu.memory_space<vmem>> -> memref<1x128xf32, #tpu.memory_space<vmem>>
      %91 = tpu.memref_slice %arg9[%59] : memref<2x!tpu.dma_semaphore, #tpu.memory_space<semaphore_mem>> -> memref<1x!tpu.dma_semaphore, #tpu.memory_space<semaphore_mem>>
      %92 = tpu.memref_squeeze %91 : memref<1x!tpu.dma_semaphore, #tpu.memory_space<semaphore_mem>> -> memref<!tpu.dma_semaphore, #tpu.memory_space<semaphore_mem>>
      tpu.enqueue_dma source(%88 : memref<1x128xf32, #tpu.memory_space<any>>) target(%90 : memref<1x128xf32, #tpu.memory_space<vmem>>) target_semaphore(%92 : memref<!tpu.dma_semaphore, #tpu.memory_space<semaphore_mem>>)
      %c3_i32 = arith.constant 3 : i32
      %93 = arith.addi %62, %c3_i32 : i32
      %94 = arith.index_cast %93 : i32 to index
      %95 = memref.load %arg2[%94] : memref<16xi32, #tpu.memory_space<smem>>
      %c0_i32_41 = arith.constant 0 : i32
      %96 = arith.maxsi %95, %c0_i32_41 : i32
      %c63_i32_42 = arith.constant 63 : i32
      %97 = arith.minsi %96, %c63_i32_42 : i32
      %c0_i32_43 = arith.constant 0 : i32
      %98 = tpu.memref_slice %arg6[%97, %c0_i32_43] : memref<64x128xf32, #tpu.memory_space<any>> -> memref<1x128xf32, #tpu.memory_space<any>>
      %c0_i32_44 = arith.constant 0 : i32
      %99 = tpu.memref_slice %arg8[%59, %c3_i32, %c0_i32_44] : memref<2x8x128xf32, #tpu.memory_space<vmem>> -> memref<1x1x128xf32, #tpu.memory_space<vmem>>
      %100 = tpu.memref_squeeze %99 : memref<1x1x128xf32, #tpu.memory_space<vmem>> -> memref<1x128xf32, #tpu.memory_space<vmem>>
      %101 = tpu.memref_slice %arg9[%59] : memref<2x!tpu.dma_semaphore, #tpu.memory_space<semaphore_mem>> -> memref<1x!tpu.dma_semaphore, #tpu.memory_space<semaphore_mem>>
      %102 = tpu.memref_squeeze %101 : memref<1x!tpu.dma_semaphore, #tpu.memory_space<semaphore_mem>> -> memref<!tpu.dma_semaphore, #tpu.memory_space<semaphore_mem>>
      tpu.enqueue_dma source(%98 : memref<1x128xf32, #tpu.memory_space<any>>) target(%100 : memref<1x128xf32, #tpu.memory_space<vmem>>) target_semaphore(%102 : memref<!tpu.dma_semaphore, #tpu.memory_space<semaphore_mem>>)
      %c4_i32 = arith.constant 4 : i32
      %103 = arith.addi %62, %c4_i32 : i32
      %104 = arith.index_cast %103 : i32 to index
      %105 = memref.load %arg2[%104] : memref<16xi32, #tpu.memory_space<smem>>
      %c0_i32_45 = arith.constant 0 : i32
      %106 = arith.maxsi %105, %c0_i32_45 : i32
      %c63_i32_46 = arith.constant 63 : i32
      %107 = arith.minsi %106, %c63_i32_46 : i32
      %c0_i32_47 = arith.constant 0 : i32
      %108 = tpu.memref_slice %arg6[%107, %c0_i32_47] : memref<64x128xf32, #tpu.memory_space<any>> -> memref<1x128xf32, #tpu.memory_space<any>>
      %c0_i32_48 = arith.constant 0 : i32
      %109 = tpu.memref_slice %arg8[%59, %c4_i32, %c0_i32_48] : memref<2x8x128xf32, #tpu.memory_space<vmem>> -> memref<1x1x128xf32, #tpu.memory_space<vmem>>
      %110 = tpu.memref_squeeze %109 : memref<1x1x128xf32, #tpu.memory_space<vmem>> -> memref<1x128xf32, #tpu.memory_space<vmem>>
      %111 = tpu.memref_slice %arg9[%59] : memref<2x!tpu.dma_semaphore, #tpu.memory_space<semaphore_mem>> -> memref<1x!tpu.dma_semaphore, #tpu.memory_space<semaphore_mem>>
      %112 = tpu.memref_squeeze %111 : memref<1x!tpu.dma_semaphore, #tpu.memory_space<semaphore_mem>> -> memref<!tpu.dma_semaphore, #tpu.memory_space<semaphore_mem>>
      tpu.enqueue_dma source(%108 : memref<1x128xf32, #tpu.memory_space<any>>) target(%110 : memref<1x128xf32, #tpu.memory_space<vmem>>) target_semaphore(%112 : memref<!tpu.dma_semaphore, #tpu.memory_space<semaphore_mem>>)
      %c5_i32 = arith.constant 5 : i32
      %113 = arith.addi %62, %c5_i32 : i32
      %114 = arith.index_cast %113 : i32 to index
      %115 = memref.load %arg2[%114] : memref<16xi32, #tpu.memory_space<smem>>
      %c0_i32_49 = arith.constant 0 : i32
      %116 = arith.maxsi %115, %c0_i32_49 : i32
      %c63_i32_50 = arith.constant 63 : i32
      %117 = arith.minsi %116, %c63_i32_50 : i32
      %c0_i32_51 = arith.constant 0 : i32
      %118 = tpu.memref_slice %arg6[%117, %c0_i32_51] : memref<64x128xf32, #tpu.memory_space<any>> -> memref<1x128xf32, #tpu.memory_space<any>>
      %c0_i32_52 = arith.constant 0 : i32
      %119 = tpu.memref_slice %arg8[%59, %c5_i32, %c0_i32_52] : memref<2x8x128xf32, #tpu.memory_space<vmem>> -> memref<1x1x128xf32, #tpu.memory_space<vmem>>
      %120 = tpu.memref_squeeze %119 : memref<1x1x128xf32, #tpu.memory_space<vmem>> -> memref<1x128xf32, #tpu.memory_space<vmem>>
      %121 = tpu.memref_slice %arg9[%59] : memref<2x!tpu.dma_semaphore, #tpu.memory_space<semaphore_mem>> -> memref<1x!tpu.dma_semaphore, #tpu.memory_space<semaphore_mem>>
      %122 = tpu.memref_squeeze %121 : memref<1x!tpu.dma_semaphore, #tpu.memory_space<semaphore_mem>> -> memref<!tpu.dma_semaphore, #tpu.memory_space<semaphore_mem>>
      tpu.enqueue_dma source(%118 : memref<1x128xf32, #tpu.memory_space<any>>) target(%120 : memref<1x128xf32, #tpu.memory_space<vmem>>) target_semaphore(%122 : memref<!tpu.dma_semaphore, #tpu.memory_space<semaphore_mem>>)
      %c6_i32 = arith.constant 6 : i32
      %123 = arith.addi %62, %c6_i32 : i32
      %124 = arith.index_cast %123 : i32 to index
      %125 = memref.load %arg2[%124] : memref<16xi32, #tpu.memory_space<smem>>
      %c0_i32_53 = arith.constant 0 : i32
      %126 = arith.maxsi %125, %c0_i32_53 : i32
      %c63_i32_54 = arith.constant 63 : i32
      %127 = arith.minsi %126, %c63_i32_54 : i32
      %c0_i32_55 = arith.constant 0 : i32
      %128 = tpu.memref_slice %arg6[%127, %c0_i32_55] : memref<64x128xf32, #tpu.memory_space<any>> -> memref<1x128xf32, #tpu.memory_space<any>>
      %c0_i32_56 = arith.constant 0 : i32
      %129 = tpu.memref_slice %arg8[%59, %c6_i32, %c0_i32_56] : memref<2x8x128xf32, #tpu.memory_space<vmem>> -> memref<1x1x128xf32, #tpu.memory_space<vmem>>
      %130 = tpu.memref_squeeze %129 : memref<1x1x128xf32, #tpu.memory_space<vmem>> -> memref<1x128xf32, #tpu.memory_space<vmem>>
      %131 = tpu.memref_slice %arg9[%59] : memref<2x!tpu.dma_semaphore, #tpu.memory_space<semaphore_mem>> -> memref<1x!tpu.dma_semaphore, #tpu.memory_space<semaphore_mem>>
      %132 = tpu.memref_squeeze %131 : memref<1x!tpu.dma_semaphore, #tpu.memory_space<semaphore_mem>> -> memref<!tpu.dma_semaphore, #tpu.memory_space<semaphore_mem>>
      tpu.enqueue_dma source(%128 : memref<1x128xf32, #tpu.memory_space<any>>) target(%130 : memref<1x128xf32, #tpu.memory_space<vmem>>) target_semaphore(%132 : memref<!tpu.dma_semaphore, #tpu.memory_space<semaphore_mem>>)
      %c7_i32 = arith.constant 7 : i32
      %133 = arith.addi %62, %c7_i32 : i32
      %134 = arith.index_cast %133 : i32 to index
      %135 = memref.load %arg2[%134] : memref<16xi32, #tpu.memory_space<smem>>
      %c0_i32_57 = arith.constant 0 : i32
      %136 = arith.maxsi %135, %c0_i32_57 : i32
      %c63_i32_58 = arith.constant 63 : i32
      %137 = arith.minsi %136, %c63_i32_58 : i32
      %c0_i32_59 = arith.constant 0 : i32
      %138 = tpu.memref_slice %arg6[%137, %c0_i32_59] : memref<64x128xf32, #tpu.memory_space<any>> -> memref<1x128xf32, #tpu.memory_space<any>>
      %c0_i32_60 = arith.constant 0 : i32
      %139 = tpu.memref_slice %arg8[%59, %c7_i32, %c0_i32_60] : memref<2x8x128xf32, #tpu.memory_space<vmem>> -> memref<1x1x128xf32, #tpu.memory_space<vmem>>
      %140 = tpu.memref_squeeze %139 : memref<1x1x128xf32, #tpu.memory_space<vmem>> -> memref<1x128xf32, #tpu.memory_space<vmem>>
      %141 = tpu.memref_slice %arg9[%59] : memref<2x!tpu.dma_semaphore, #tpu.memory_space<semaphore_mem>> -> memref<1x!tpu.dma_semaphore, #tpu.memory_space<semaphore_mem>>
      %142 = tpu.memref_squeeze %141 : memref<1x!tpu.dma_semaphore, #tpu.memory_space<semaphore_mem>> -> memref<!tpu.dma_semaphore, #tpu.memory_space<semaphore_mem>>
      tpu.enqueue_dma source(%138 : memref<1x128xf32, #tpu.memory_space<any>>) target(%140 : memref<1x128xf32, #tpu.memory_space<vmem>>) target_semaphore(%142 : memref<!tpu.dma_semaphore, #tpu.memory_space<semaphore_mem>>)
      %c8_i32_61 = arith.constant 8 : i32
    } else {
    }
    %c0_i32_3 = arith.constant 0 : i32
    %c0_i32_4 = arith.constant 0 : i32
    %8 = tpu.memref_slice %arg8[%0, %c0_i32_3, %c0_i32_4] : memref<2x8x128xf32, #tpu.memory_space<vmem>> -> memref<1x8x128xf32, #tpu.memory_space<vmem>>
    %9 = tpu.memref_squeeze %8 : memref<1x8x128xf32, #tpu.memory_space<vmem>> -> memref<8x128xf32, #tpu.memory_space<vmem>>
    %c0_i32_5 = arith.constant 0 : i32
    %c0_i32_6 = arith.constant 0 : i32
    %10 = tpu.memref_slice %arg8[%0, %c0_i32_5, %c0_i32_6] : memref<2x8x128xf32, #tpu.memory_space<vmem>> -> memref<1x8x128xf32, #tpu.memory_space<vmem>>
    %11 = tpu.memref_squeeze %10 : memref<1x8x128xf32, #tpu.memory_space<vmem>> -> memref<8x128xf32, #tpu.memory_space<vmem>>
    %12 = tpu.memref_slice %arg9[%0] : memref<2x!tpu.dma_semaphore, #tpu.memory_space<semaphore_mem>> -> memref<1x!tpu.dma_semaphore, #tpu.memory_space<semaphore_mem>>
    %13 = tpu.memref_squeeze %12 : memref<1x!tpu.dma_semaphore, #tpu.memory_space<semaphore_mem>> -> memref<!tpu.dma_semaphore, #tpu.memory_space<semaphore_mem>>
    tpu.wait_dma2 semaphore(%13 : memref<!tpu.dma_semaphore, #tpu.memory_space<semaphore_mem>>) src(%9 : memref<8x128xf32, #tpu.memory_space<vmem>>) dst(%11 : memref<8x128xf32, #tpu.memory_space<vmem>>)
    %14 = arith.index_cast %0 : i32 to index
    %c0 = arith.constant 0 : index
    %c0_7 = arith.constant 0 : index
    %15 = vector.load %arg8[%14, %c0, %c0_7] : memref<2x8x128xf32, #tpu.memory_space<vmem>>, vector<1x8x128xf32>
    %16 = vector.shape_cast %15 : vector<1x8x128xf32> to vector<8x128xf32>
    %c0_8 = arith.constant 0 : index
    %c0_9 = arith.constant 0 : index
    %17 = vector.load %arg3[%c0_8, %c0_9] : memref<8x128xf32, #tpu.memory_space<vmem>>, vector<8x128xf32>
    %c0_10 = arith.constant 0 : index
    %c0_11 = arith.constant 0 : index
    %c0_12 = arith.constant 0 : index
    %18 = vector.load %arg4[%c0_10, %c0_11, %c0_12] : memref<1x8x1xi32, #tpu.memory_space<vmem>>, vector<1x8x1xi32>
    %19 = vector.shape_cast %18 : vector<1x8x1xi32> to vector<8x1xi32>
    %cst = arith.constant 0.000000e+00 : f32
    %20 = vector.broadcast %cst : f32 to vector<8x128xf32>
    %c0_13 = arith.constant 0 : index
    %c0_14 = arith.constant 0 : index
    %21 = vector.load %arg5[%c0_13, %c0_14] : memref<3x128xf32, #tpu.memory_space<vmem>>, vector<1x128xf32>
    %22 = vector.shape_cast %21 : vector<1x128xf32> to vector<128xf32>
    %23 = vector.shape_cast %22 : vector<128xf32> to vector<1x128xf32>
    %c0_i32_15 = arith.constant 0 : i32
    %24 = vector.broadcast %c0_i32_15 : i32 to vector<8x1xi32>
    %25 = arith.cmpi eq, %19, %24 : vector<8x1xi32>
    %26 = vector.shape_cast %25 : vector<8x1xi1> to vector<8x1xi1>
    %27 = vector.broadcast %26 : vector<8x1xi1> to vector<8x128xi1>
    %28 = vector.shape_cast %23 : vector<1x128xf32> to vector<1x128xf32>
    %29 = vector.broadcast %28 : vector<1x128xf32> to vector<8x128xf32>
    %30 = arith.select %27, %29, %20 : vector<8x128xi1>, vector<8x128xf32>
    %c1 = arith.constant 1 : index
    %c0_16 = arith.constant 0 : index
    %31 = vector.load %arg5[%c1, %c0_16] : memref<3x128xf32, #tpu.memory_space<vmem>>, vector<1x128xf32>
    %32 = vector.shape_cast %31 : vector<1x128xf32> to vector<128xf32>
    %33 = vector.shape_cast %32 : vector<128xf32> to vector<1x128xf32>
    %c1_i32_17 = arith.constant 1 : i32
    %34 = vector.broadcast %c1_i32_17 : i32 to vector<8x1xi32>
    %35 = arith.cmpi eq, %19, %34 : vector<8x1xi32>
    %36 = vector.shape_cast %35 : vector<8x1xi1> to vector<8x1xi1>
    %37 = vector.broadcast %36 : vector<8x1xi1> to vector<8x128xi1>
    %38 = vector.shape_cast %33 : vector<1x128xf32> to vector<1x128xf32>
    %39 = vector.broadcast %38 : vector<1x128xf32> to vector<8x128xf32>
    %40 = arith.select %37, %39, %30 : vector<8x128xi1>, vector<8x128xf32>
    %c2 = arith.constant 2 : index
    %c0_18 = arith.constant 0 : index
    %41 = vector.load %arg5[%c2, %c0_18] : memref<3x128xf32, #tpu.memory_space<vmem>>, vector<1x128xf32>
    %42 = vector.shape_cast %41 : vector<1x128xf32> to vector<128xf32>
    %43 = vector.shape_cast %42 : vector<128xf32> to vector<1x128xf32>
    %c2_i32_19 = arith.constant 2 : i32
    %44 = vector.broadcast %c2_i32_19 : i32 to vector<8x1xi32>
    %45 = arith.cmpi eq, %19, %44 : vector<8x1xi32>
    %46 = vector.shape_cast %45 : vector<8x1xi1> to vector<8x1xi1>
    %47 = vector.broadcast %46 : vector<8x1xi1> to vector<8x128xi1>
    %48 = vector.shape_cast %43 : vector<1x128xf32> to vector<1x128xf32>
    %49 = vector.broadcast %48 : vector<1x128xf32> to vector<8x128xf32>
    %50 = arith.select %47, %49, %40 : vector<8x128xi1>, vector<8x128xf32>
    %51 = arith.addf %16, %16 : vector<8x128xf32>
    %52 = arith.addf %51, %50 : vector<8x128xf32>
    %53 = arith.addf %52, %17 : vector<8x128xf32>
    %c0_20 = arith.constant 0 : index
    %c0_21 = arith.constant 0 : index
    %c0_22 = arith.constant 0 : index
    %54 = vector.load %arg7[%c0_20, %c0_21, %c0_22] : memref<1x8x128xf32, #tpu.memory_space<vmem>>, vector<1x8x128xf32>
    %55 = vector.shape_cast %54 : vector<1x8x128xf32> to vector<8x128xf32>
    %56 = vector.shape_cast %53 : vector<8x128xf32> to vector<1x8x128xf32>
    tpu.vector_store %arg7[%c0_20, %c0_21, %c0_22], %56 {strides = array<i32>} : memref<1x8x128xf32, #tpu.memory_space<vmem>>, vector<1x8x128xf32>,
    return
  }
  func.func @transform_0(%arg0: i32, %arg1: i32, %arg2: memref<16xi32, #tpu.memory_space<smem>>) -> (i32, i32) {
    %c0_i32 = arith.constant 0 : i32
    %c0_i32_0 = arith.constant 0 : i32
    return %arg1, %c0_i32 : i32, i32
  }
  func.func @transform_1(%arg0: i32, %arg1: i32, %arg2: memref<16xi32, #tpu.memory_space<smem>>) -> (i32, i32, i32) {
    %c0_i32 = arith.constant 0 : i32
    %c0_i32_0 = arith.constant 0 : i32
    return %arg0, %arg1, %c0_i32 : i32, i32, i32
  }
  func.func @transform_2(%arg0: i32, %arg1: i32, %arg2: memref<16xi32, #tpu.memory_space<smem>>) -> (i32, i32) {
    %c0_i32 = arith.constant 0 : i32
    %c0_i32_0 = arith.constant 0 : i32
    %c0_i32_1 = arith.constant 0 : i32
    return %c0_i32, %c0_i32_0 : i32, i32
  }
  func.func @transform_4(%arg0: i32, %arg1: i32, %arg2: memref<16xi32, #tpu.memory_space<smem>>) -> (i32, i32, i32) {
    %c0_i32 = arith.constant 0 : i32
    %c0_i32_0 = arith.constant 0 : i32
    return %arg0, %arg1, %c0_i32 : i32, i32, i32
  }
}

</mosaic_0001>

<bundles_post_ra>
// kernel: tpu_custom_call.1
= control target key start
LH: loop header
LB: loop body
LE: loop exit
PB: predicated region body
PF: predicated region fallthrough
CT: control target
= control target key end

     0   :  { %s1616_s0 = inlined_call_operand.vmem [shape: s32[16], index: 0, kind: input, shape index: {}]   ;;  %s1617_s1 = inlined_call_operand.vmem [shape: f32[8,128], index: 1, kind: input, shape index: {}]   ;;  %s1618_s2 = inlined_call_operand.vmem [shape: s32[2,8,1], index: 2, kind: input, shape index: {}]   ;;  %s1619_s3 = inlined_call_operand.vmem [shape: f32[3,128], index: 3, kind: input, shape index: {}]   ;;  %s1620_s4 = inlined_call_operand.hbm [shape: f32[64,128], index: 4, kind: input, shape index: {}]   ;;  %s1621_s5 = inlined_call_operand.hbm [shape: f32[2,8,128], index: 5, kind: output, shape index: {}]  }
   0x1   :  { %1628 = sst [smem:[#allocation51_spill]] %s1618_s2  ;;  %s10_s20 = sshll.u32 %s1616_s0, 4  ;;  %s11_s20 = int_to_ptr.vmem [resolvable:$true] %s10_s20 }
   0x2   :  { %s1010_s21 = scalar_lea.vmem %s11_s20, 16  ;;  %p1015_p1 = scmp.lt.s32.totalorder %s11_s20, %s11_s20 }
   0x3   :  { %p1011_p0 = scmp.ne.s32.totalorder %s11_s20, %s1010_s21  ;;  %p1016_p2 = scmp.lt.s32.totalorder %s1010_s21, %s1010_s21 }
   0x5   :  { %p1017_p3 = por %p1016_p2, %p1015_p1 }
   0x7   :  { %p1018_p4 = pnand %p1017_p3, %p1011_p0 }
   0x9   :  { %1021 = shalt.err (!%p1018_p4)  }
   0xa   :  { %s1280_s22 = smov [#allocation5]  }
   0xb   :  { %13 = dma.vmem_to_smem %s11_s20, 16, %s1280_s22, [#allocation4] }
   0xc   :  { %1248 = dma.done.wait [#allocation4], 16 }
   0xd   :  { %1249 = vsyncadd [#allocation4], 4294967280 }
   0xe   :  { %15 = sfence }
   0xf   :  { %16 = vsyncpa [#allocation7], 0 }
  0x10   :  { %18 = vsyncpa [#allocation7 + $0x1], 0  ;;  %s1324_s23 = smov 0   ;;  %s1326_s24 = smov 0  }
  0x11   :  { %s1328_s0 = smov 0   ;;  %s1330_s25 = smov 0  }
  0x12   :  { %s1332_s26 = smov 0   ;;  %s1334_s27 = smov 0  }
  0x13 LB: > { %1629 = sst [smem:[#allocation45_spill]] %s1258_s23  ;;  %s789_s28 = sadd.s32 4294967295, %s1278_s27   ;;  %s1278_s27 = sphi %s1334_s27, %s24_s27   ;;  %s1274_s26 = sphi %s1332_s26, %s1644_s26   ;;  %s1270_s25 = sphi %s1330_s25, %s1643_s25   ;;  %s1266_s0 = sphi %s1328_s0, %s1642_s0   ;;  %s1262_s24 = sphi %s1326_s24, %s1646_s24   ;;  %s1258_s23 = sphi %s1324_s23, %s1645_s23  }
  0x14   : > { %1630 = sst [smem:[#allocation46_spill]] %s1266_s0  ;;  %s790_s29 = sadd.s32 4294967294, %s1278_s27  }
  0x15   : > { %1631 = sst [smem:[#allocation47_spill]] %s1274_s26  ;;  %s36_s30 = sadd.s32 1, %s1274_s26 }
  0x16   : > { %s120_s6 = sadd.s32 1, %s1266_s0  ;;  %p38_p5 = scmp.ge.s32.totalorder %s36_s30, 2 }
  0x17   : > { %p130_p6 = scmp.ne.s32.totalorder %s1266_s0, %s1262_s24  ;;  %p131_p7 = scmp.eq.s32.totalorder %s789_s28, 1 }
  0x18   : > { %p136_p8 = scmp.ne.s32.totalorder %s1262_s24, %s1258_s23  ;;  %s1648_s30 = smov (%p38_p5, %s36_s30), 0 }
  0x19   : > { %1632 = sst [smem:[#allocation48_spill]] %s1648_s30  ;;  %p1364_p9 = por %p131_p7, %p130_p6 }
  0x1a   : > { %p137_p10 = scmp.eq.s32.totalorder %s790_s29, 1  ;;  %s115_s8 = ssub.s32 %s1274_s26, %s1648_s30 }
  0x1b   : > { %p794_p11 = scmp.ge.s32.totalorder %s1278_s27, 1  ;;  %p118_p12 = scmp.eq.s32.totalorder %s115_s8, 0 }
  0x1c   : > { %p1371_p13 = por %p137_p10, %p136_p8  ;;  %p175_p0 = scmp.lt.s32.totalorder %s1278_s27, 3 }
  0x1d   : > { %s1377_s10 = scalar_select %p118_p12, %s1266_s0, %s120_s6  }
  0x1e   : > { %s1634_s9 = scalar_select %p1371_p13, 1, 0 }
  0x1f   : > { %1636 = sst [smem:[#allocation50_spill]] %s1377_s10  ;;  %p176_p1 = pnand %p794_p11, %p175_p0 }
  0x20   : > { %1635 = sst [smem:[#allocation49_spill]] %s1634_s9  ;;  %s1622_s11 = sand.u32 (!%p176_p1), 1, %s1262_s24  }
  0x21   : > { %179 = sbr.rel (%p176_p1) target bundleno = 377 (0x179), region = 32  ;;  %p209_p2 = scmp.lt.s32.totalorder (!%p176_p1), %s1270_s25, 1 }
  0x22   : > { %s1383_s12 = sshll.u32 (!%p176_p1), %s1622_s11, 3  ;;  %s1386_s13 = sshll.u32 (!%p176_p1), %s1270_s25, 3 }
  0x23   : > { %s227_s14 = sld [smem:[#allocation5 + %s1386_s13]] (!%p176_p1)  ;;  %s245_s16 = sadd.s32 (!%p176_p1), 1, %s1386_s13 }
  0x24   : > { %s1281_s18 = smov (!%p176_p1), [#allocation2]   ;;  %s1637_s2 = sld [smem:[#allocation51_spill]] (!%p176_p1) }
  0x25   : > { %s241_s19 = sshll.u32 (!%p176_p1), %s1281_s18, 4  ;;  %s1398_s28 = sld [smem:[#allocation5 + %s245_s16]] (!%p176_p1)  ;;  %s1396_s19 = int_to_ptr.vmem [resolvable:$true] %s241_s19 }
  0x26   : > { %s210_s15 = scalar_select %p209_p2, %s1270_s25, 1 }
  0x27   : > { %s1282_s29 = smov [#allocation2 + $0x1]   ;;  %s265_s8 = sadd.s32 2, %s1386_s13 }
  0x28   : > { %s796_s17 = sshll.u32 %s210_s15, 3  ;;  %s261_s6 = sshll.u32 %s1282_s29, 4  ;;  %s1401_s6 = int_to_ptr.vmem [resolvable:$true] %s261_s6 }
  0x29   : > { %p228_p3 = scmp.gt.s32.totalorder %s227_s14, 0  ;;  %p798_p4 = scmp.lt.s32.totalorder %s227_s14, 63 }
  0x2a   : > { %s1394_s22 = scalar_lea.vmem %s1637_s2, %s796_s17  ;;  %s1403_s15 = sld [smem:[#allocation5 + %s265_s8]] }
  0x2b   : > { %s1650_s14 = smov (!%p228_p3, %s227_s14), 0  ;;  %p247_p5 = scmp.gt.s32.totalorder %s1398_s28, 0 }
  0x2c   : > { %s1652_s14 = smov (!%p798_p4, %s1650_s14), 63  ;;  %p804_p6 = scmp.lt.s32.totalorder %s1398_s28, 63 }
  0x2d   : > { %s803_s17 = sshll.u32 %s1652_s14, 4  ;;  %s1283_s21 = smov [#allocation2 + $0x2]  }
  0x2e   : > { %s233_s16 = scalar_lea.hbm %s1620_s4, %s803_s17  ;;  %s281_s11 = sshll.u32 %s1283_s21, 4  ;;  %s1436_s11 = int_to_ptr.vmem [resolvable:$true] %s281_s11 }
  0x2f   : > { %s1022_s2 = scalar_lea.hbm %s233_s16, 16  ;;  %s1413_s26 = scalar_lea.hbm %s1620_s4, 1024 }
  0x30   : > { %p1023_p7 = scmp.ne.s32.totalorder %s233_s16, %s1022_s2  ;;  %p1025_p8 = scmp.lt.s32.totalorder %s233_s16, %s1620_s4 }
  0x31   : > { %p1026_p10 = scmp.lt.s32.totalorder %s1413_s26, %s1022_s2 }
  0x33   : > { %p1027_p11 = por %p1026_p10, %p1025_p8 }
  0x35   : > { %p1028_p12 = pnand %p1027_p11, %p1023_p7 }
  0x37   : > { %1031 = shalt.err (!%p1028_p12)  }
  0x38   : > { %s1032_s14 = scalar_lea.vmem %s1396_s19, 16  ;;  %s1422_s17 = scalar_lea.vmem %s1396_s19, 256 }
  0x39   : > { %p1033_p0 = scmp.ne.s32.totalorder %s1396_s19, %s1032_s14  ;;  %p1037_p1 = scmp.lt.s32.totalorder %s1396_s19, %s1396_s19 }
  0x3a   : > { %p1038_p2 = scmp.lt.s32.totalorder %s1422_s17, %s1032_s14 }
  0x3c   : > { %p1039_p3 = por %p1038_p2, %p1037_p1 }
  0x3e   : > { %p1040_p4 = pnand %p1039_p3, %p1033_p0 }
  0x40   : > { %1043 = shalt.err (!%p1040_p4)  }
  0x41   : > { %244 = dma.hbm_to_vmem [thread:$0]  %s233_s16, 16, %s1396_s19, [#allocation3] }
  0x42   : > { %s248_s2 = scalar_select %p247_p5, %s1398_s28, 0 }
  0x43   : > { %p267_p7 = scmp.gt.s32.totalorder %s1403_s15, 0  ;;  %p810_p8 = scmp.lt.s32.totalorder %s1403_s15, 63 }
  0x44   : > { %s1654_s2 = smov (!%p804_p6, %s248_s2), 63  ;;  %s285_s29 = sadd.s32 3, %s1386_s13 }
  0x45   : > { %s268_s30 = scalar_select %p267_p7, %s1403_s15, 0 }
  0x46   : > { %s809_s10 = sshll.u32 %s1654_s2, 4 }
  0x47   : > { %s252_s21 = scalar_lea.hbm %s1620_s4, %s809_s10 }
  0x48   : > { %s1044_s8 = scalar_lea.hbm %s252_s21, 16  ;;  %p1047_p11 = scmp.lt.s32.totalorder %s252_s21, %s1620_s4 }
  0x49   : > { %p1045_p10 = scmp.ne.s32.totalorder %s252_s21, %s1044_s8  ;;  %p1048_p5 = scmp.lt.s32.totalorder %s1413_s26, %s1044_s8 }
  0x4b   : > { %p1049_p12 = por %p1048_p5, %p1047_p11 }
  0x4d   : > { %p1050_p0 = pnand %p1049_p12, %p1045_p10 }
  0x4f   : > { %1053 = shalt.err (!%p1050_p0)  }
  0x50   : > { %s1054_s28 = scalar_lea.vmem %s1401_s6, 16  ;;  %p1059_p1 = scmp.lt.s32.totalorder %s1401_s6, %s1396_s19 }
  0x51   : > { %p1055_p6 = scmp.ne.s32.totalorder %s1401_s6, %s1054_s28  ;;  %p1060_p2 = scmp.lt.s32.totalorder %s1422_s17, %s1054_s28 }
  0x53   : > { %p1061_p3 = por %p1060_p2, %p1059_p1 }
  0x55   : > { %p1062_p4 = pnand %p1061_p3, %p1055_p6 }
  0x57   : > { %1065 = shalt.err (!%p1062_p4)  }
  0x58   : > { %264 = dma.hbm_to_vmem [thread:$0]  %s252_s21, 16, %s1401_s6, [#allocation3] }
  0x59   : > { %s1656_s30 = smov (!%p810_p8, %s268_s30), 63  ;;  %s1454_s0 = sld [smem:[#allocation5 + %s285_s29]] }
  0x5a   : > { %s815_s16 = sshll.u32 %s1656_s30, 4  ;;  %s1284_s20 = smov [#allocation2 + $0x3]  }
  0x5b   : > { %s272_s18 = scalar_lea.hbm %s1620_s4, %s815_s16  ;;  %s301_s8 = sshll.u32 %s1284_s20, 4  ;;  %s1470_s8 = int_to_ptr.vmem [resolvable:$true] %s301_s8 }
  0x5c   : > { %s1066_s14 = scalar_lea.hbm %s272_s18, 16  ;;  %p1069_p10 = scmp.lt.s32.totalorder %s272_s18, %s1620_s4 }
  0x5d   : > { %p1067_p7 = scmp.ne.s32.totalorder %s272_s18, %s1066_s14  ;;  %p1070_p11 = scmp.lt.s32.totalorder %s1413_s26, %s1066_s14 }
  0x5f   : > { %p1071_p5 = por %p1070_p11, %p1069_p10 }
  0x61   : > { %p1072_p12 = pnand %p1071_p5, %p1067_p7 }
  0x63   : > { %1075 = shalt.err (!%p1072_p12)  }
  0x64   : > { %s1076_s6 = scalar_lea.vmem %s1436_s11, 16  ;;  %p1081_p0 = scmp.lt.s32.totalorder %s1436_s11, %s1396_s19 }
  0x65   : > { %p1077_p8 = scmp.ne.s32.totalorder %s1436_s11, %s1076_s6  ;;  %p1082_p6 = scmp.lt.s32.totalorder %s1422_s17, %s1076_s6 }
  0x67   : > { %p1083_p1 = por %p1082_p6, %p1081_p0 }
  0x69   : > { %p1084_p2 = pnand %p1083_p1, %p1077_p8 }
  0x6b   : > { %1087 = shalt.err (!%p1084_p2)  }
  0x6c   : > { %284 = dma.hbm_to_vmem [thread:$0]  %s272_s18, 16, %s1436_s11, [#allocation3] }
  0x6d   : > { %s305_s9 = sadd.s32 4, %s1386_s13  ;;  %p287_p3 = scmp.gt.s32.totalorder %s1454_s0, 0 }
  0x6e   : > { %s1472_s15 = sld [smem:[#allocation5 + %s305_s9]]  ;;  %p816_p4 = scmp.lt.s32.totalorder %s1454_s0, 63 }
  0x6f   : > { %s1285_s30 = smov [#allocation2 + $0x4]   ;;  %s325_s29 = sadd.s32 5, %s1386_s13 }
  0x70   : > { %s321_s21 = sshll.u32 %s1285_s30, 4  ;;  %s1658_s0 = smov (!%p287_p3, %s1454_s0), 0  ;;  %s1481_s21 = int_to_ptr.vmem [resolvable:$true] %s321_s21 }
  0x71   : > { %s1478_s16 = sld [smem:[#allocation5 + %s325_s29]]  ;;  %s1660_s0 = smov (!%p816_p4, %s1658_s0), 63 }
  0x72   : > { %s821_s11 = sshll.u32 %s1660_s0, 4  ;;  %s1286_s20 = smov [#allocation2 + $0x5]  }
  0x73   : > { %s292_s18 = scalar_lea.hbm %s1620_s4, %s821_s11  ;;  %s1487_s14 = sshll.u32 %s1286_s20, 4  ;;  %s342_s14 = int_to_ptr.vmem [resolvable:$true] %s1487_s14 }
  0x74   : > { %p307_p7 = scmp.gt.s32.totalorder %s1472_s15, 0  ;;  %p822_p10 = scmp.lt.s32.totalorder %s1472_s15, 63 }
  0x75   : > { %s1088_s28 = scalar_lea.hbm %s292_s18, 16  ;;  %p1091_p5 = scmp.lt.s32.totalorder %s292_s18, %s1620_s4 }
  0x76   : > { %p1089_p11 = scmp.ne.s32.totalorder %s292_s18, %s1088_s28  ;;  %p1092_p12 = scmp.lt.s32.totalorder %s1413_s26, %s1088_s28 }
  0x78   : > { %p1093_p8 = por %p1092_p12, %p1091_p5 }
  0x7a   : > { %p1094_p0 = pnand %p1093_p8, %p1089_p11 }
  0x7c   : > { %1097 = shalt.err (!%p1094_p0)  }
  0x7d   : > { %s1098_s0 = scalar_lea.vmem %s1470_s8, 16  ;;  %p1103_p1 = scmp.lt.s32.totalorder %s1470_s8, %s1396_s19 }
  0x7e   : > { %p1099_p6 = scmp.ne.s32.totalorder %s1470_s8, %s1098_s0  ;;  %p1104_p2 = scmp.lt.s32.totalorder %s1422_s17, %s1098_s0 }
  0x80   : > { %p1105_p3 = por %p1104_p2, %p1103_p1 }
  0x82   : > { %p1106_p4 = pnand %p1105_p3, %p1099_p6 }
  0x84   : > { %1109 = shalt.err (!%p1106_p4)  }
  0x85   : > { %304 = dma.hbm_to_vmem [thread:$0]  %s292_s18, 16, %s1470_s8, [#allocation3] }
  0x86   : > { %s308_s30 = scalar_select %p307_p7, %s1472_s15, 0 }
  0x87   : > { %p327_p11 = scmp.gt.s32.totalorder %s1478_s16, 0  ;;  %p828_p5 = scmp.lt.s32.totalorder %s1478_s16, 63 }
  0x88   : > { %s1662_s30 = smov (!%p822_p10, %s308_s30), 63  ;;  %s345_s2 = sadd.s32 6, %s1386_s13 }
  0x89   : > { %s328_s29 = scalar_select %p327_p11, %s1478_s16, 0 }
  0x8a   : > { %s827_s11 = sshll.u32 %s1662_s30, 4  ;;  %s1511_s6 = sld [smem:[#allocation5 + %s345_s2]] }
  0x8b   : > { %s312_s28 = scalar_lea.hbm %s1620_s4, %s827_s11 }
  0x8c   : > { %s1110_s9 = scalar_lea.hbm %s312_s28, 16  ;;  %p1113_p8 = scmp.lt.s32.totalorder %s312_s28, %s1620_s4 }
  0x8d   : > { %p1111_p12 = scmp.ne.s32.totalorder %s312_s28, %s1110_s9  ;;  %p1114_p7 = scmp.lt.s32.totalorder %s1413_s26, %s1110_s9 }
  0x8f   : > { %p1115_p0 = por %p1114_p7, %p1113_p8 }
  0x91   : > { %p1116_p6 = pnand %p1115_p0, %p1111_p12 }
  0x93   : > { %1119 = shalt.err (!%p1116_p6)  }
  0x94   : > { %s1120_s8 = scalar_lea.vmem %s1481_s21, 16  ;;  %p1125_p1 = scmp.lt.s32.totalorder %s1481_s21, %s1396_s19 }
  0x95   : > { %p1121_p10 = scmp.ne.s32.totalorder %s1481_s21, %s1120_s8  ;;  %p1126_p2 = scmp.lt.s32.totalorder %s1422_s17, %s1120_s8 }
  0x97   : > { %p1127_p3 = por %p1126_p2, %p1125_p1 }
  0x99   : > { %p1128_p4 = pnand %p1127_p3, %p1121_p10 }
  0x9b   : > { %1131 = shalt.err (!%p1128_p4)  }
  0x9c   : > { %324 = dma.hbm_to_vmem [thread:$0]  %s312_s28, 16, %s1481_s21, [#allocation3] }
  0x9d   : > { %s1664_s29 = smov (!%p828_p5, %s328_s29), 63  ;;  %s365_s11 = sadd.s32 7, %s1386_s13 }
  0x9e   : > { %s833_s23 = sshll.u32 %s1664_s29, 4 }
  0x9f   : > { %s332_s30 = scalar_lea.hbm %s1620_s4, %s833_s23 }
  0xa0   : > { %s1132_s2 = scalar_lea.hbm %s332_s30, 16  ;;  %p1135_p12 = scmp.lt.s32.totalorder %s332_s30, %s1620_s4 }
  0xa1   : > { %p1133_p11 = scmp.ne.s32.totalorder %s332_s30, %s1132_s2  ;;  %p1136_p8 = scmp.lt.s32.totalorder %s1413_s26, %s1132_s2 }
  0xa3   : > { %p1137_p7 = por %p1136_p8, %p1135_p12 }
  0xa5   : > { %p1138_p0 = pnand %p1137_p7, %p1133_p11 }
  0xa7   : > { %1141 = shalt.err (!%p1138_p0)  }
  0xa8   : > { %s1142_s21 = scalar_lea.vmem %s342_s14, 16  ;;  %p1147_p6 = scmp.lt.s32.totalorder %s342_s14, %s1396_s19 }
  0xa9   : > { %p1143_p5 = scmp.ne.s32.totalorder %s342_s14, %s1142_s21  ;;  %p1148_p10 = scmp.lt.s32.totalorder %s1422_s17, %s1142_s21 }
  0xab   : > { %p1149_p1 = por %p1148_p10, %p1147_p6 }
  0xad   : > { %p1150_p2 = pnand %p1149_p1, %p1143_p5 }
  0xaf   : > { %1153 = shalt.err (!%p1150_p2)  }
  0xb0   : > { %344 = dma.hbm_to_vmem [thread:$0]  %s332_s30, 16, %s342_s14, [#allocation3] }
  0xb1   : > { %p347_p3 = scmp.gt.s32.totalorder %s1511_s6, 0  ;;  %p834_p4 = scmp.lt.s32.totalorder %s1511_s6, 63 }
  0xb2   : > { %s1287_s13 = smov [#allocation2 + $0x6]   ;;  %s366_s29 = sld [smem:[#allocation5 + %s365_s11]] }
  0xb3   : > { %s361_s16 = sshll.u32 %s1287_s13, 4  ;;  %s1666_s6 = smov (!%p347_p3, %s1511_s6), 0  ;;  %s362_s16 = int_to_ptr.vmem [resolvable:$true] %s361_s16 }
  0xb4   : > { %s1668_s6 = smov (!%p834_p4, %s1666_s6), 63 }
  0xb5   : > { %s839_s28 = sshll.u32 %s1668_s6, 4 }
  0xb6   : > { %s352_s8 = scalar_lea.hbm %s1620_s4, %s839_s28 }
  0xb7   : > { %s1154_s23 = scalar_lea.hbm %s352_s8, 16  ;;  %p1157_p8 = scmp.lt.s32.totalorder %s352_s8, %s1620_s4 }
  0xb8   : > { %p367_p11 = scmp.gt.s32.totalorder %s366_s29, 0  ;;  %p1155_p12 = scmp.ne.s32.totalorder %s352_s8, %s1154_s23 }
  0xb9   : > { %p1158_p7 = scmp.lt.s32.totalorder %s1413_s26, %s1154_s23 }
  0xbb   : > { %p1159_p0 = por %p1158_p7, %p1157_p8 }
  0xbd   : > { %p1160_p5 = pnand %p1159_p0, %p1155_p12 }
  0xbf   : > { %1163 = shalt.err (!%p1160_p5)  }
  0xc0   : > { %s1164_s18 = scalar_lea.vmem %s362_s16, 16  ;;  %p1169_p10 = scmp.lt.s32.totalorder %s362_s16, %s1396_s19 }
  0xc1   : > { %p1165_p6 = scmp.ne.s32.totalorder %s362_s16, %s1164_s18  ;;  %p1170_p1 = scmp.lt.s32.totalorder %s1422_s17, %s1164_s18 }
  0xc3   : > { %p1171_p2 = por %p1170_p1, %p1169_p10 }
  0xc5   : > { %p1172_p3 = pnand %p1171_p2, %p1165_p6 }
  0xc7   : > { %1175 = shalt.err (!%p1172_p3)  }
  0xc8   : > { %364 = dma.hbm_to_vmem [thread:$0]  %s352_s8, 16, %s362_s16, [#allocation3] }
  0xc9   : > { %s368_s6 = scalar_select %p367_p11, %s366_s29, 0 }
  0xca   : > { %p840_p4 = scmp.lt.s32.totalorder %s366_s29, 63  ;;  %s1288_s30 = smov [#allocation2 + $0x7]  }
  0xcb   : > { %s381_s11 = sshll.u32 %s1288_s30, 4  ;;  %s382_s11 = int_to_ptr.vmem [resolvable:$true] %s381_s11 }
  0xcc   : > { %s1670_s6 = smov (!%p840_p4, %s368_s6), 63 }
  0xcd   : > { %s845_s2 = sshll.u32 %s1670_s6, 4 }
  0xce   : > { %s372_s21 = scalar_lea.hbm %s1620_s4, %s845_s2 }
  0xcf   : > { %s1176_s13 = scalar_lea.hbm %s372_s21, 16  ;;  %p1179_p8 = scmp.lt.s32.totalorder %s372_s21, %s1620_s4 }
  0xd0   : > { %p1177_p12 = scmp.ne.s32.totalorder %s372_s21, %s1176_s13  ;;  %p1180_p7 = scmp.lt.s32.totalorder %s1413_s26, %s1176_s13 }
  0xd2   : > { %p1181_p0 = por %p1180_p7, %p1179_p8 }
  0xd4   : > { %p1182_p5 = pnand %p1181_p0, %p1177_p12 }
  0xd6   : > { %1185 = shalt.err (!%p1182_p5)  }
  0xd7   : > { %s1186_s16 = scalar_lea.vmem %s382_s11, 16  ;;  %p1191_p6 = scmp.lt.s32.totalorder %s382_s11, %s1396_s19 }
  0xd8   : > { %p1187_p11 = scmp.ne.s32.totalorder %s382_s11, %s1186_s16  ;;  %p1192_p10 = scmp.lt.s32.totalorder %s1422_s17, %s1186_s16 }
  0xda   : > { %p1193_p1 = por %p1192_p10, %p1191_p6 }
  0xdc   : > { %p1194_p2 = pnand %p1193_p1, %p1187_p11 }
  0xde   : > { %1197 = shalt.err (!%p1194_p2)  }
  0xdf   : > { %384 = dma.hbm_to_vmem [thread:$0]  %s372_s21, 16, %s382_s11, [#allocation3] }
  0xe0   : > { %s204_s29 = scalar_lea.vmem [#allocation6], %s1383_s12 }
  0xe1   : > { %1250 = dma.done.wait [#allocation3], 128 }
  0xe2   : > { %1251 = vsyncadd [#allocation3], 4294967168  ;;  %v1289_v0 = vmov 0   ;;  %v575_v1 = vld [vmem:[%s1394_s22] sm:$0xff]  ;;  %s906_s15 = sshll.u32 %s1270_s25, 7  ;;  %s631_s18 = sshll.u32 %s204_s29, 4  ;;  %s632_s18 = int_to_ptr.vmem [resolvable:$true] %s631_s18 }
  0xe3   : > { %1008 = vset.pattern.permute.xlu0 %v1289_v0  ;;  %1009 = vset.pattern.permute.xlu1 %v1289_v0  ;;  %vm577_vm0 = vcmp.eq.s32.totalorder %v575_v1, 0  ;;  %vm589_vm1 = vcmp.eq.s32.totalorder %v575_v1, 1  ;;  %vm601_vm2 = vcmp.eq.s32.totalorder %v575_v1, 2  ;;  %v573_v7 = vld [vmem:[#allocation2] sm:$0xff]  ;;  %s629_s11 = scalar_lea.hbm %s1621_s5, %s906_s15  ;;  %s1638_s2 = sand.u32 1, %s1262_s24  }
  0xe4   : > { %v578_v2 = vsel %vm577_vm0, 1, %v1289_v0  ;;  %v602_v3 = vsel %vm601_vm2, 1, %v1289_v0  ;;  %v590_v4 = vsel %vm589_vm1, 1, %v1289_v0  ;;  %v902_v8 = vld [vmem:[%s1619_s3] ss:$0 sm:$0xff]  ;;  %v612_v12 = vadd.f32 %v573_v7, %v573_v7  ;;  %s617_s10 = scalar_lea.sflag [#allocation7], %s1638_s2 }
  0xe5   : > { %580 = vperm.xlu0 %1008, %v578_v2   ;;  %604 = vperm.xlu1 %1009, %v602_v3   ;;  %v903_v9 = vld [vmem:[%s1619_s3 + $0x1] ss:$0 sm:$0xff]  ;;  %v904_v11 = vld [vmem:[%s1619_s3 + $0x2] ss:$0 sm:$0xff]  ;;  %s1198_s20 = scalar_lea.vmem %s632_s18, 128  ;;  %s1290_s21 = smov [#allocation6]  }
  0xe6   : > { %v574_v15 = vld [vmem:[%s1617_s1] sm:$0xff]  ;;  %p1199_p3 = scmp.ne.s32.totalorder %s632_s18, %s1198_s20  ;;  %s1202_s25 = sshll.u32 %s1290_s21, 4  ;;  %s1203_s25 = int_to_ptr.vmem [resolvable:$false] %s1202_s25 }
  0xe7   : > { %s1204_s13 = scalar_lea.vmem %s1203_s25, 256  ;;  %p1205_p8 = scmp.lt.s32.totalorder %s632_s18, %s1203_s25 }
  0xe8   : > { %p1200_p4 = pnand %p1199_p3, %p1364_p9  ;;  %p1206_p7 = scmp.lt.s32.totalorder %s1204_s13, %s1198_s20 }
  0xe9   : > { %592 = vperm.xlu0 %1008, %v590_v4  }
  0xea   : > { %p1201_p12 = pneg %p1200_p4  ;;  %p1207_p0 = por %p1206_p7, %p1205_p8 }
  0xec   : > { %p1208_p5 = pnand %p1207_p0, %p1201_p12 }
 0x160   : > { %v581_v5 = vpop.permute.xlu0 %580  ;;  %v605_v6 = vpop.permute.xlu1 %604 }
 0x161   : > { %vm582_vm3 = vcmp.eq.s32.totalorder %v581_v5, 1  ;;  %vm606_vm4 = vcmp.eq.s32.totalorder %v605_v6, 1 }
 0x162   : > { %v587_v13 = vsel %vm582_vm3, %v902_v8, 0.0 }
 0x164   : > { %v593_v10 = vpop.permute.xlu0 %592 }
 0x165   : > { %vm594_vm5 = vcmp.eq.s32.totalorder %v593_v10, 1 }
 0x166   : > { %v599_v14 = vsel %vm594_vm5, %v903_v9, %v587_v13 }
 0x167   : > { %v611_v16 = vsel %vm606_vm4, %v904_v11, %v599_v14 }
 0x168   : > { %v613_v17 = vadd.f32 %v612_v12, %v611_v16 }
 0x16a   : > { %v614_v18 = vadd.f32 %v613_v17, %v574_v15 }
 0x16c   : > { %615 = vst [vmem:[%s204_s29] sm:$0xff] %v614_v18 }
 0x16d   : > { %1211 = shalt.err (!%p1208_p5)
}
 0x16e   : > { %s1212_s28 = scalar_lea.hbm %s629_s11, 128  ;;  %s1216_s16 = scalar_lea.hbm %s1621_s5, 256 }
 0x16f   : > { %p1213_p11 = scmp.ne.s32.totalorder %s629_s11, %s1212_s28  ;;  %p1217_p1 = scmp.lt.s32.totalorder %s629_s11, %s1621_s5 }
 0x170   : > { %p1218_p2 = scmp.lt.s32.totalorder %s1216_s16, %s1212_s28 }
 0x171   : > { %p1214_p6 = pnand %p1213_p11, %p1364_p9 }
 0x172   : > { %p1219_p3 = por %p1218_p2, %p1217_p1 }
 0x173   : > { %p1215_p10 = pneg %p1214_p6 }
 0x175   : > { %p1220_p4 = pnand %p1219_p3, %p1215_p10 }
 0x177   : > { %1223 = shalt.err (!%p1220_p4)
}
 0x178   : > { %943 = dma.vmem_to_hbm [thread:$0]  (%p1364_p9), %s632_s18, 128, %s629_s11, %s617_s10  }
 0x179 PF: > { %s1639_s19 = sld [smem:[#allocation45_spill]]  ;;  %p949_p12 = scmp.ge.s32.totalorder %s1278_s27, 2 }
 0x17b   : > { %p946_p8 = pnand %p949_p12, %p1371_p13 }
 0x17d   : > { %p947_p7 = pneg %p946_p8 }
 0x17f   : > { %s643_s17 = sand.u32 1, %s1639_s19  }
 0x180   : > { %s644_s0 = scalar_lea.sflag [#allocation7], %s643_s17 }
 0x181   : > { %1253 = dma.done.wait (%p947_p7), %s644_s0, 128  }
 0x182   : > { %1255 = vsyncadd (%p947_p7), %s644_s0, 4294967168  ;;  %s24_s27 = sadd.s32 1, %s1278_s27   ;;  %s1641_s8 = sld [smem:[#allocation46_spill]] }
 0x183   : > { %p21_p0 = scmp.ge.s32.totalorder %s24_s27, 4   ;;  %s1642_s0 = sld [smem:[#allocation50_spill]] }
 0x184   : > { %s1643_s25 = sld [smem:[#allocation47_spill]]  ;;  %s1645_s23 = smov %s1262_s24 }
 0x185   : > { %s1644_s26 = sld [smem:[#allocation48_spill]]  ;;  %23 = sbr.rel (!%p21_p0) target bundleno = 19 (0x13), region = 177 }
 0x188   : > { %s1646_s24 = smov %s1641_s8 }
 0x18a   :  { %649 = vsyncpa [#allocation7], 1 }
 0x18b   :  { %651 = vsyncpa [#allocation7 + $0x1], 1 }
 0x18c   :  { %652 = vsyncmov [#allocation3] }
 0x18f   :  { %s653_s7 = vpop.sfrf %652 }
 0x190   :  { %p909_p9 = scmp.ne.s32.totalorder %s653_s7, 0 }
 0x192   :  { %657 = shalt.err (%p909_p9)  }
 0x193   :  { %659 = vsyncmov [#allocation3 + $0x1] }
 0x196   :  { %s660_s14 = vpop.sfrf %659 }
 0x197   :  { %p910_p13 = scmp.ne.s32.totalorder %s660_s14, 0 }
 0x199   :  { %664 = shalt.err (%p910_p13)  }

</bundles_post_ra>
